<compile_context>
chip_gen: v7x
topology: tpu7x:2x2x1
jax: 0.10.0
libtpu: 0.0.40
codegen_flags: <defaults>
</compile_context>

<pallas_src>
import functools

import jax
import jax.numpy as jnp
from jax.experimental import pallas as pl
from jax.experimental.pallas import tpu as pltpu


def _layernorm_kernel(x_ref, gamma_ref, beta_ref, o_ref,
                      sum_ref, sq_ref, scale_ref, shift_ref, *, eps, inv_n):
    phase = pl.program_id(1)          # 0 = stats sweep, 1 = apply sweep
    t = pl.program_id(2)
    nt = pl.num_programs(2)
    is_stats = phase == 0

    @pl.when(is_stats & (t == 0))
    def _init():
        sum_ref[...] = jnp.zeros_like(sum_ref)
        sq_ref[...] = jnp.zeros_like(sq_ref)

    @pl.when(is_stats)
    def _accumulate():
        x = x_ref[...].astype(jnp.float32)        # (1, TR, C)
        sum_ref[...] += jnp.sum(x, axis=1)        # per-lane partial sums
        sq_ref[...] += jnp.sum(x * x, axis=1)     # single pass: E[x^2] term

    @pl.when(is_stats & (t == nt - 1))
    def _finalize():
        total = jnp.sum(sum_ref[...])             # cross-lane reduce, once/batch
        total_sq = jnp.sum(sq_ref[...])
        mean = total * inv_n
        var = jnp.maximum(total_sq * inv_n - mean * mean, 0.0)
        rstd = jax.lax.rsqrt(var + eps)           # EUP rsqrt, no per-elem divide
        g = gamma_ref[...].astype(jnp.float32)    # (1, C), resident (const index)
        b = beta_ref[...].astype(jnp.float32)
        sc = g * rstd
        scale_ref[...] = sc                       # scale = gamma * rstd
        shift_ref[...] = b - mean * sc            # shift = beta - mean * scale

    @pl.when(phase == 1)
    def _apply():
        x = x_ref[...].astype(jnp.float32)        # (1, TR, C)
        o_ref[...] = (x * scale_ref[...] + shift_ref[...]).astype(o_ref.dtype)


def _choose_layout(S, D):
    """View the per-batch (S, D) slab as (R, C) with C a lane-dense multiple
    of 128. C = k*D with k | S, so gamma/beta tile cleanly to length C.
    Falls back to (S, D) when no such factorization exists (toy shapes)."""
    if D % 128 == 0:
        return S, D, 1
    for k in range(1, S + 1):
        if S % k == 0 and (k * D) % 128 == 0:
            return S // k, k * D, k
    return S, D, 1


def _pick_row_tile(R, C, itemsize, target_bytes=2 * 1024 * 1024):
    """Largest row tile TR that divides R, keeps the (1, TR, C) block around
    target_bytes, and respects the (8,128) rule (multiple of 8 or TR == R)."""
    if R * C * itemsize <= target_bytes:
        return R
    max_tr = target_bytes // (C * itemsize)
    tr = (min(max_tr, R) // 8) * 8
    while tr >= 8:
        if R % tr == 0:
            return tr
        tr -= 8
    return R  # no suitable divisor; full row is still correct (more VMEM)


def layer_normalization(x, gamma, beta, eps=1e-5):
    """Pallas TPU LayerNormalization matching the PyTorch module.

    x:     (B, S, D);  gamma, beta: (D,)
    Each batch element is normalized over its last two dims jointly.
    """
    B, S, D = x.shape
    R, C, k = _choose_layout(S, D)
    itemsize = x.dtype.itemsize
    TR = _pick_row_tile(R, C, itemsize)
    T = R // TR

    x3 = x.reshape(B, R, C)                       # pure row-major reshape
    gamma_row = jnp.tile(gamma, k).reshape(1, C)  # built once in the wrapper
    beta_row = jnp.tile(beta, k).reshape(1, C)

    kernel = functools.partial(_layernorm_kernel, eps=float(eps),
                               inv_n=1.0 / float(S * D))

    # Explicit scoped-VMEM budget: double-buffered x + out blocks, resident
    # gamma/beta blocks, f32 stat/scale/shift scratch, plus headroom.
    block_bytes = TR * C * itemsize
    vmem_needed = 4 * block_bytes + 4 * C * itemsize + 4 * C * 4
    vmem_limit = min(max(2 * vmem_needed + (2 << 20), 16 << 20), 64 << 20)

    out3 = pl.pallas_call(
        kernel,
        out_shape=jax.ShapeDtypeStruct((B, R, C), x.dtype),
        grid_spec=pltpu.PrefetchScalarGridSpec(
            num_scalar_prefetch=0,
            # (batch, phase, row-tile): phase 0 = stats, phase 1 = apply.
            grid=(B, 2, T),
            in_specs=[
                pl.BlockSpec((1, TR, C), lambda b, p, t: (b, t, 0)),
                pl.BlockSpec((1, C), lambda b, p, t: (0, 0)),
                pl.BlockSpec((1, C), lambda b, p, t: (0, 0)),
            ],
            # During the stats phase the output block index is pinned to
            # (b, 0); it is only written (fully) during the apply phase, so no
            # garbage ever reaches HBM and each block is written exactly once.
            out_specs=pl.BlockSpec((1, TR, C), lambda b, p, t: (b, t * p, 0)),
            scratch_shapes=[
                pltpu.VMEM((1, C), jnp.float32),   # per-lane sum
                pltpu.VMEM((1, C), jnp.float32),   # per-lane sum of squares
                pltpu.VMEM((1, C), jnp.float32),   # scale = gamma * rstd
                pltpu.VMEM((1, C), jnp.float32),   # shift = beta - mean*scale
            ],
        ),
        compiler_params=pltpu.CompilerParams(
            dimension_semantics=("parallel", "arbitrary", "arbitrary"),
            vmem_limit_bytes=vmem_limit,
        ),
    )(x3, gamma_row, beta_row)

    return out3.reshape(B, S, D)


def _reference(x, gamma, beta, eps=1e-5):
    mean = jnp.mean(x, axis=(-1, -2), keepdims=True)
    var = jnp.mean((x - mean) ** 2, axis=(-1, -2), keepdims=True)
    y = (x - mean) / jnp.sqrt(var + eps)
    return gamma * y + beta


if __name__ == "__main__":
    B, S, D = 2, 8, 32
    key = jax.random.PRNGKey(0)
    x = jax.random.normal(key, (B, S, D), dtype=jnp.float32)

    # Deterministic parameter init matching the PyTorch module __init__.
    gamma = jnp.ones((D,), dtype=jnp.float32)
    beta = jnp.zeros((D,), dtype=jnp.float32)

    out = layer_normalization(x, gamma, beta, eps=1e-5)
    out = jax.block_until_ready(out)

    ref = _reference(x, gamma, beta, eps=1e-5)
    assert out.shape == (B, S, D)
    assert jnp.allclose(out, ref, atol=1e-5, rtol=1e-5)

    print("KERNEL_OK")
</pallas_src>

<mosaic_0001>
module attributes {stable_mosaic.version = 11 : i64} {
  func.func @_layernorm_kernel(%arg0: i32, %arg1: i32, %arg2: i32, %arg3: memref<1x2x128xf32, #tpu.memory_space<vmem>>, %arg4: memref<1x128xf32, #tpu.memory_space<vmem>>, %arg5: memref<1x128xf32, #tpu.memory_space<vmem>>, %arg6: memref<1x2x128xf32, #tpu.memory_space<vmem>>, %arg7: memref<1x128xf32, #tpu.memory_space<vmem>>, %arg8: memref<1x128xf32, #tpu.memory_space<vmem>>, %arg9: memref<1x128xf32, #tpu.memory_space<vmem>>, %arg10: memref<1x128xf32, #tpu.memory_space<vmem>>) attributes {dimension_semantics = [#tpu.dimension_semantics<parallel>, #tpu.dimension_semantics<arbitrary>, #tpu.dimension_semantics<arbitrary>], iteration_bounds = array<i64: 2, 2, 1>, scalar_prefetch = 0 : i64, scratch_operands = 4 : i64, tpu.core_type = #tpu.core_type<tc>, window_params = [{transform_indices = @transform_0, window_bounds = array<i64: 1, 2, 128>}, {pipeline_mode = #tpu.pipeline_mode<synchronous>, transform_indices = @transform_1, window_bounds = array<i64: 1, 128>}, {pipeline_mode = #tpu.pipeline_mode<synchronous>, transform_indices = @transform_2, window_bounds = array<i64: 1, 128>}, {transform_indices = @transform_3, window_bounds = array<i64: 1, 2, 128>}]} {
    %c0_i32 = arith.constant 0 : i32
    %0 = arith.cmpi eq, %arg1, %c0_i32 : i32
    %c0_i32_0 = arith.constant 0 : i32
    %1 = arith.cmpi eq, %arg2, %c0_i32_0 : i32
    %2 = arith.andi %0, %1 : i1
    %3 = arith.extui %2 : i1 to i32
    %c0_i32_1 = arith.constant 0 : i32
    %4 = arith.cmpi ne, %3, %c0_i32_1 : i32
    scf.if %4 {
      %cst = arith.constant 0.000000e+00 : f32
      %14 = vector.broadcast %cst : f32 to vector<1x128xf32>
      %c0 = arith.constant 0 : index
      %c0_6 = arith.constant 0 : index
      %15 = vector.load %arg7[%c0, %c0_6] : memref<1x128xf32, #tpu.memory_space<vmem>>, vector<1x128xf32>
      tpu.vector_store %arg7[%c0, %c0_6], %14 {strides = array<i32>} : memref<1x128xf32, #tpu.memory_space<vmem>>, vector<1x128xf32>,
      %cst_7 = arith.constant 0.000000e+00 : f32
      %16 = vector.broadcast %cst_7 : f32 to vector<1x128xf32>
      %c0_8 = arith.constant 0 : index
      %c0_9 = arith.constant 0 : index
      %17 = vector.load %arg8[%c0_8, %c0_9] : memref<1x128xf32, #tpu.memory_space<vmem>>, vector<1x128xf32>
      tpu.vector_store %arg8[%c0_8, %c0_9], %16 {strides = array<i32>} : memref<1x128xf32, #tpu.memory_space<vmem>>, vector<1x128xf32>,
    } else {
    }
    %5 = arith.extui %0 : i1 to i32
    %c0_i32_2 = arith.constant 0 : i32
    %6 = arith.cmpi ne, %5, %c0_i32_2 : i32
    scf.if %6 {
      %c0 = arith.constant 0 : index
      %c0_6 = arith.constant 0 : index
      %c0_7 = arith.constant 0 : index
      %14 = vector.load %arg3[%c0, %c0_6, %c0_7] : memref<1x2x128xf32, #tpu.memory_space<vmem>>, vector<1x2x128xf32>
      %c0_8 = arith.constant 0 : index
      %c0_9 = arith.constant 0 : index
      %15 = vector.load %arg7[%c0_8, %c0_9] : memref<1x128xf32, #tpu.memory_space<vmem>>, vector<1x128xf32>
      %cst = arith.constant dense<0.000000e+00> : vector<1x128xf32>
      %16 = vector.multi_reduction <add>, %14, %cst [1] : vector<1x2x128xf32> to vector<1x128xf32>
      %17 = arith.addf %15, %16 : vector<1x128xf32>
      %c0_10 = arith.constant 0 : index
      %c0_11 = arith.constant 0 : index
      %18 = vector.load %arg7[%c0_10, %c0_11] : memref<1x128xf32, #tpu.memory_space<vmem>>, vector<1x128xf32>
      tpu.vector_store %arg7[%c0_10, %c0_11], %17 {strides = array<i32>} : memref<1x128xf32, #tpu.memory_space<vmem>>, vector<1x128xf32>,
      %c0_12 = arith.constant 0 : index
      %c0_13 = arith.constant 0 : index
      %19 = vector.load %arg8[%c0_12, %c0_13] : memref<1x128xf32, #tpu.memory_space<vmem>>, vector<1x128xf32>
      %20 = arith.mulf %14, %14 : vector<1x2x128xf32>
      %cst_14 = arith.constant dense<0.000000e+00> : vector<1x128xf32>
      %21 = vector.multi_reduction <add>, %20, %cst_14 [1] : vector<1x2x128xf32> to vector<1x128xf32>
      %22 = arith.addf %19, %21 : vector<1x128xf32>
      %c0_15 = arith.constant 0 : index
      %c0_16 = arith.constant 0 : index
      %23 = vector.load %arg8[%c0_15, %c0_16] : memref<1x128xf32, #tpu.memory_space<vmem>>, vector<1x128xf32>
      tpu.vector_store %arg8[%c0_15, %c0_16], %22 {strides = array<i32>} : memref<1x128xf32, #tpu.memory_space<vmem>>, vector<1x128xf32>,
    } else {
    }
    %c0_i32_3 = arith.constant 0 : i32
    %7 = arith.cmpi eq, %arg2, %c0_i32_3 : i32
    %8 = arith.andi %0, %7 : i1
    %9 = arith.extui %8 : i1 to i32
    %c0_i32_4 = arith.constant 0 : i32
    %10 = arith.cmpi ne, %9, %c0_i32_4 : i32
    scf.if %10 {
      %c0 = arith.constant 0 : index
      %c0_6 = arith.constant 0 : index
      %14 = vector.load %arg7[%c0, %c0_6] : memref<1x128xf32, #tpu.memory_space<vmem>>, vector<1x128xf32>
      %15 = vector.shape_cast %14 : vector<1x128xf32> to vector<1x1x128xf32>
      %cst = arith.constant dense<0.000000e+00> : vector<1xf32>
      %16 = vector.multi_reduction <add>, %15, %cst [1, 2] : vector<1x1x128xf32> to vector<1xf32>
      %17 = vector.shape_cast %16 : vector<1xf32> to vector<1x1x1xf32>
      %18 = vector.extract %17[0, 0, 0] : f32 from vector<1x1x1xf32>
      %c0_7 = arith.constant 0 : index
      %c0_8 = arith.constant 0 : index
      %19 = vector.load %arg8[%c0_7, %c0_8] : memref<1x128xf32, #tpu.memory_space<vmem>>, vector<1x128xf32>
      %20 = vector.shape_cast %19 : vector<1x128xf32> to vector<1x1x128xf32>
      %cst_9 = arith.constant dense<0.000000e+00> : vector<1xf32>
      %21 = vector.multi_reduction <add>, %20, %cst_9 [1, 2] : vector<1x1x128xf32> to vector<1xf32>
      %22 = vector.shape_cast %21 : vector<1xf32> to vector<1x1x1xf32>
      %23 = vector.extract %22[0, 0, 0] : f32 from vector<1x1x1xf32>
      %cst_10 = arith.constant 3.906250e-03 : f32
      %24 = arith.mulf %18, %cst_10 : f32
      %cst_11 = arith.constant 3.906250e-03 : f32
      %25 = arith.mulf %23, %cst_11 : f32
      %26 = arith.mulf %24, %24 : f32
      %27 = arith.subf %25, %26 : f32
      %cst_12 = arith.constant 0.000000e+00 : f32
      %28 = arith.maximumf %27, %cst_12 : f32
      %cst_13 = arith.constant 9.99999974E-6 : f32
      %29 = arith.addf %28, %cst_13 : f32
      %30 = math.rsqrt %29 : f32
      %c0_14 = arith.constant 0 : index
      %c0_15 = arith.constant 0 : index
      %31 = vector.load %arg4[%c0_14, %c0_15] : memref<1x128xf32, #tpu.memory_space<vmem>>, vector<1x128xf32>
      %c0_16 = arith.constant 0 : index
      %c0_17 = arith.constant 0 : index
      %32 = vector.load %arg5[%c0_16, %c0_17] : memref<1x128xf32, #tpu.memory_space<vmem>>, vector<1x128xf32>
      %33 = vector.broadcast %30 : f32 to vector<1x128xf32>
      %34 = arith.mulf %31, %33 : vector<1x128xf32>
      %c0_18 = arith.constant 0 : index
      %c0_19 = arith.constant 0 : index
      %35 = vector.load %arg9[%c0_18, %c0_19] : memref<1x128xf32, #tpu.memory_space<vmem>>, vector<1x128xf32>
      tpu.vector_store %arg9[%c0_18, %c0_19], %34 {strides = array<i32>} : memref<1x128xf32, #tpu.memory_space<vmem>>, vector<1x128xf32>,
      %36 = vector.broadcast %24 : f32 to vector<1x128xf32>
      %37 = arith.mulf %36, %34 : vector<1x128xf32>
      %38 = arith.subf %32, %37 : vector<1x128xf32>
      %c0_20 = arith.constant 0 : index
      %c0_21 = arith.constant 0 : index
      %39 = vector.load %arg10[%c0_20, %c0_21] : memref<1x128xf32, #tpu.memory_space<vmem>>, vector<1x128xf32>
      tpu.vector_store %arg10[%c0_20, %c0_21], %38 {strides = array<i32>} : memref<1x128xf32, #tpu.memory_space<vmem>>, vector<1x128xf32>,
    } else {
    }
    %c1_i32 = arith.constant 1 : i32
    %11 = arith.cmpi eq, %arg1, %c1_i32 : i32
    %12 = arith.extui %11 : i1 to i32
    %c0_i32_5 = arith.constant 0 : i32
    %13 = arith.cmpi ne, %12, %c0_i32_5 : i32
    scf.if %13 {
      %c0 = arith.constant 0 : index
      %c0_6 = arith.constant 0 : index
      %c0_7 = arith.constant 0 : index
      %14 = vector.load %arg3[%c0, %c0_6, %c0_7] : memref<1x2x128xf32, #tpu.memory_space<vmem>>, vector<1x2x128xf32>
      %c0_8 = arith.constant 0 : index
      %c0_9 = arith.constant 0 : index
      %15 = vector.load %arg9[%c0_8, %c0_9] : memref<1x128xf32, #tpu.memory_space<vmem>>, vector<1x128xf32>
      %16 = vector.shape_cast %15 : vector<1x128xf32> to vector<1x1x128xf32>
      %17 = vector.broadcast %16 : vector<1x1x128xf32> to vector<1x2x128xf32>
      %18 = arith.mulf %14, %17 : vector<1x2x128xf32>
      %c0_10 = arith.constant 0 : index
      %c0_11 = arith.constant 0 : index
      %19 = vector.load %arg10[%c0_10, %c0_11] : memref<1x128xf32, #tpu.memory_space<vmem>>, vector<1x128xf32>
      %20 = vector.shape_cast %19 : vector<1x128xf32> to vector<1x1x128xf32>
      %21 = vector.broadcast %20 : vector<1x1x128xf32> to vector<1x2x128xf32>
      %22 = arith.addf %18, %21 : vector<1x2x128xf32>
      %c0_12 = arith.constant 0 : index
      %c0_13 = arith.constant 0 : index
      %c0_14 = arith.constant 0 : index
      %23 = vector.load %arg6[%c0_12, %c0_13, %c0_14] : memref<1x2x128xf32, #tpu.memory_space<vmem>>, vector<1x2x128xf32>
      tpu.vector_store %arg6[%c0_12, %c0_13, %c0_14], %22 {strides = array<i32>} : memref<1x2x128xf32, #tpu.memory_space<vmem>>, vector<1x2x128xf32>,
    } else {
    }
    return
  }
  func.func @transform_0(%arg0: i32, %arg1: i32, %arg2: i32) -> (i32, i32, i32) {
    %c0_i32 = arith.constant 0 : i32
    %c0_i32_0 = arith.constant 0 : i32
    return %arg0, %arg2, %c0_i32 : i32, i32, i32
  }
  func.func @transform_1(%arg0: i32, %arg1: i32, %arg2: i32) -> (i32, i32) {
    %c0_i32 = arith.constant 0 : i32
    %c0_i32_0 = arith.constant 0 : i32
    %c0_i32_1 = arith.constant 0 : i32
    return %c0_i32, %c0_i32_0 : i32, i32
  }
  func.func @transform_2(%arg0: i32, %arg1: i32, %arg2: i32) -> (i32, i32) {
    %c0_i32 = arith.constant 0 : i32
    %c0_i32_0 = arith.constant 0 : i32
    %c0_i32_1 = arith.constant 0 : i32
    return %c0_i32, %c0_i32_0 : i32, i32
  }
  func.func @transform_3(%arg0: i32, %arg1: i32, %arg2: i32) -> (i32, i32, i32) {
    %0 = arith.muli %arg2, %arg1 : i32
    %c0_i32 = arith.constant 0 : i32
    %c0_i32_0 = arith.constant 0 : i32
    return %arg0, %0, %c0_i32 : i32, i32, i32
  }
}

</mosaic_0001>

<bundles_post_ra>
// kernel: tpu_custom_call.1
= control target key start
LH: loop header
LB: loop body
LE: loop exit
PB: predicated region body
PF: predicated region fallthrough
CT: control target
= control target key end

     0   :  { %s880_s0 = inlined_call_operand.hbm [shape: f32[2,2,128], index: 0, kind: input, shape index: {}]   ;;  %s881_s1 = inlined_call_operand.vmem [shape: f32[1,128], index: 1, kind: input, shape index: {}]   ;;  %s882_s2 = inlined_call_operand.vmem [shape: f32[1,128], index: 2, kind: input, shape index: {}]   ;;  %s883_s3 = inlined_call_operand.hbm [shape: f32[2,2,128], index: 3, kind: output, shape index: {}]  }
   0x1   :  { %886 = sst [smem:[#allocation13_spill]] %s880_s0 }
   0x2   :  { %8 = vsyncpa [#allocation7], 0 }
   0x3   :  { %10 = vsyncpa [#allocation7 + $0x1], 0 }
   0x4   :  { %11 = vsyncpa [#allocation8], 0 }
   0x5   :  { %13 = vsyncpa [#allocation8 + $0x1], 0  ;;  %s675_s12 = smov 0   ;;  %s677_s13 = smov 0  }
   0x6   :  { %s679_s14 = smov 0   ;;  %s681_s15 = smov 0  }
   0x7   :  { %s683_s16 = smov 0   ;;  %s685_s17 = smov 0  }
   0x8   :  { %s687_s18 = smov 0   ;;  %s689_s19 = smov 0  }
   0x9 LB: > { %s414_s20 = sadd.s32 4294967295, %s649_s19   ;;  %s415_s21 = sadd.s32 4294967294, %s649_s19   ;;  %s649_s19 = sphi %s689_s19, %s19_s19   ;;  %s645_s18 = sphi %s687_s18, %s905_s18   ;;  %s641_s17 = sphi %s685_s17, %s904_s17   ;;  %s637_s16 = sphi %s683_s16, %s903_s16   ;;  %s633_s15 = sphi %s681_s15, %s902_s15   ;;  %s629_s14 = sphi %s679_s14, %s901_s14   ;;  %s625_s13 = sphi %s677_s13, %s900_s13   ;;  %s621_s12 = sphi %s675_s12, %s899_s12  }
   0xa   : > { %s34_s22 = sadd.s32 1, %s641_s17  ;;  %s38_s23 = sadd.s32 1, %s645_s18 }
   0xb   : > { %p36_p0 = scmp.ge.s32.totalorder %s34_s22, 2  ;;  %s47_s24 = sadd.s32 1, %s629_s14 }
   0xc   : > { %p54_p1 = scmp.ne.s32.totalorder %s629_s14, %s625_s13  ;;  %p55_p2 = scmp.eq.s32.totalorder %s649_s19, 0 }
   0xd   : > { %s907_s22 = smov (%p36_p0, %s34_s22), 0  ;;  %s909_s23 = smov (!%p36_p0, %s38_s23), %s645_s18 }
   0xe   : > { %p726_p3 = por %p55_p2, %p54_p1  ;;  %p60_p4 = scmp.ne.s32.totalorder %s625_s13, %s621_s12 }
   0xf   : > { %p40_p5 = scmp.ge.s32.totalorder %s909_s23, 2  ;;  %p61_p6 = scmp.eq.s32.totalorder %s414_s20, 0 }
  0x10   : > { %p130_p7 = scmp.eq.s32.totalorder %s414_s20, 3  ;;  %p136_p8 = scmp.eq.s32.totalorder %s415_s21, 3 }
  0x11   : > { %s911_s23 = smov (%p40_p5, %s909_s23), 0  ;;  %p734_p9 = por %p61_p6, %p60_p4 }
  0x12   : > { %888 = sst [smem:[#allocation12_spill]] %s911_s23  ;;  %p738_p10 = por %p130_p7, %p54_p1 }
  0x13   : > { %s42_s28 = ssub.s32 %s645_s18, %s911_s23  ;;  %p744_p11 = por %p136_p8, %p60_p4 }
  0x14   : > { %s890_s27 = scalar_select %p738_p10, 1, 0 }
  0x15   : > { %s891_s29 = scalar_select %p744_p11, 1, 0 }
  0x16   : > { %p45_p12 = scmp.eq.s32.totalorder %s42_s28, 0  ;;  %p451_p13 = scmp.lt.s32.totalorder %s649_s19, 4 }
  0x17   : > { %s162_s30 = sand.u32 1, %s629_s14   ;;  %s419_s6 = sshll.u32 %s645_s18, 5 }
  0x18   : > { %s751_s4 = scalar_select %p45_p12, %s629_s14, %s47_s24  }
  0x19   : > { %s418_s5 = sshll.u32 %s162_s30, 1  ;;  %s892_s0 = sld [smem:[#allocation13_spill]] }
  0x1a   : > { %s166_s10 = scalar_lea.vmem [#allocation6], %s418_s5  ;;  %p763_p0 = pnand %p451_p13, %p726_p3 }
  0x1b   : > { %s174_s11 = sshll.u32 %s166_s10, 4  ;;  %s163_s21 = scalar_lea.sflag [#allocation7], %s162_s30  ;;  %s759_s11 = int_to_ptr.vmem [resolvable:$true] %s174_s11 }
  0x1c   : > { %p523_p5 = pneg %p763_p0 }
  0x1f   : > { %s757_s9 = scalar_lea.hbm %s892_s0, %s419_s6  ;;  %s526_s25 = scalar_lea.hbm %s892_s0, 64 }
  0x20   : > { %s521_s24 = scalar_lea.hbm %s757_s9, 32  ;;  %p527_p3 = scmp.lt.u32.totalorder %s757_s9, %s892_s0 }
  0x21   : > { %p522_p4 = scmp.ne.s32.totalorder %s757_s9, %s521_s24  ;;  %p528_p8 = scmp.lt.u32.totalorder %s526_s25, %s521_s24 }
  0x22   : > { %p530_p13 = scmp.lt.u32.totalorder %s521_s24, %s757_s9 }
  0x23   : > { %p524_p6 = pnand %p523_p5, %p522_p4  ;;  %p529_p12 = por %p528_p8, %p527_p3 }
  0x25   : > { %p525_p7 = pneg %p524_p6  ;;  %p531_p1 = por %p530_p13, %p529_p12 }
  0x27   : > { %p532_p2 = pnand %p531_p1, %p525_p7 }
  0x29   : > { %535 = shalt.err (!%p532_p2)
}
  0x2a   : > { %s536_s30 = scalar_lea.vmem %s759_s11, 32  ;;  %s651_s8 = smov [#allocation6]  }
  0x2b   : > { %p537_p4 = scmp.ne.s32.totalorder %s759_s11, %s536_s30  ;;  %s541_s10 = sshll.u32 %s651_s8, 4  ;;  %s542_s10 = int_to_ptr.vmem [resolvable:$false] %s541_s10 }
  0x2c   : > { %s543_s28 = scalar_lea.vmem %s542_s10, 64  ;;  %p544_p10 = scmp.lt.s32.totalorder %s759_s11, %s542_s10 }
  0x2d   : > { %p539_p6 = pnand %p537_p4, %p523_p5  ;;  %p545_p3 = scmp.lt.s32.totalorder %s543_s28, %s536_s30 }
  0x2f   : > { %p540_p11 = pneg %p539_p6  ;;  %p546_p8 = por %p545_p3, %p544_p10 }
  0x31   : > { %p547_p12 = pnand %p546_p8, %p540_p11 }
  0x33   : > { %550 = shalt.err (!%p547_p12)
}
  0x34   : > { %446 = dma.hbm_to_vmem [thread:$0]  (!%p763_p0), %s757_s9, 32, %s759_s11, %s163_s21  }
  0x35   : > { %p894_p1 = scmp.lt.s32.totalorder %s649_s19, 5  ;;  %p895_p2 = scmp.ge.s32.totalorder %s649_s19, 1 }
  0x37   : > { %p180_p5 = pnand %p895_p2, %p894_p1 }
  0x38   : > { %s799_s24 = sand.u32 (!%p180_p5), 1, %s625_s13  }
  0x39   : > { %183 = sbr.rel (%p180_p5) target bundleno = 420 (0x1a4), region = 32  ;;  %s421_s5 = sshll.u32 (!%p180_p5), %s799_s24, 1 }
  0x3a   : > { %s186_s25 = scalar_lea.sflag (!%p180_p5), [#allocation7], %s799_s24  ;;  %s803_s6 = scalar_lea.vmem (!%p180_p5), [#allocation6], %s421_s5 }
  0x40   : > { %612 = dma.done.wait (%p734_p9), %s186_s25, 32  }
  0x41   : > { %614 = vsyncadd (%p734_p9), %s186_s25, 4294967264  ;;  %p213_p10 = scmp.eq.s32.totalorder %s633_s15, 0  ;;  %s810_s9 = scalar_lea.vmem [#allocation9], %s421_s5 }
  0x42   : > { %v652_v0 = vmov (%p213_p10), 0.0  }
  0x43   : > { %218 = sbr.rel (!%p213_p10) target bundleno = 74 (0x4a), region = 40  ;;  %219 = vst [vmem:[#allocation2] sm:$0x1] (%p213_p10), %v652_v0  ;;  %220 = vst [vmem:[#allocation3] sm:$0x1] (%p213_p10), %v652_v0 }
  0x4a PF: > { %p424_p11 = scmp.ne.s32.totalorder %s633_s15, 0 }
  0x4b   : > { %v224_v1 = vld [vmem:[%s803_s6] sm:$0x3] (!%p424_p11)  ;;  %vm226_vm0 = vcmask (!%p424_p11), 1041408   ;;  %v225_v14 = vld [vmem:[#allocation2] sm:$0x1] (!%p424_p11) }
  0x4c   : > { %223 = sbr.rel (%p424_p11) target bundleno = 94 (0x5e), region = 44  ;;  %v227_v2 = vsel (!%p424_p11), %vm226_vm0, %v224_v1, 0.0  ;;  %v237_v3 = vmul.f32 (!%p424_p11), %v224_v1, %v224_v1  ;;  %v236_v17 = vld [vmem:[#allocation3] sm:$0x1] (!%p424_p11) }
  0x4d   : > { %v228_v4 = vrot.slane (!%p424_p11), %v227_v2, 4 }
  0x4e   : > { %v238_v5 = vsel (!%p424_p11), %vm226_vm0, %v237_v3, 0.0 }
  0x4f   : > { %v229_v6 = vadd.f32 (!%p424_p11), %v228_v4, %v227_v2  ;;  %v239_v7 = vrot.slane (!%p424_p11), %v238_v5, 4 }
  0x51   : > { %v230_v8 = vrot.slane (!%p424_p11), %v229_v6, 2  ;;  %v240_v9 = vadd.f32 (!%p424_p11), %v239_v7, %v238_v5 }
  0x53   : > { %v231_v10 = vadd.f32 %v230_v8, %v229_v6  ;;  %v241_v11 = vrot.slane %v240_v9, 2 }
  0x55   : > { %v232_v12 = vrot.slane %v231_v10, 1  ;;  %v242_v13 = vadd.f32 %v241_v11, %v240_v9 }
  0x57   : > { %v233_v15 = vadd.f32 %v232_v12, %v231_v10  ;;  %v243_v16 = vrot.slane %v242_v13, 1 }
  0x59   : > { %v234_v18 = vadd.f32 %v233_v15, %v225_v14  ;;  %v244_v19 = vadd.f32 %v243_v16, %v242_v13 }
  0x5b   : > { %235 = vst [vmem:[#allocation2] sm:$0x1] %v234_v18  ;;  %v245_v20 = vadd.f32 %v244_v19, %v236_v17 }
  0x5d   : > { %246 = vst [vmem:[#allocation3] sm:$0x1] %v245_v20 }
  0x5e PF: > { %248 = sbr.rel (!%p213_p10) target bundleno = 385 (0x181), region = 48  ;;  %vm250_vm1 = vcmask (%p213_p10), 1040384   ;;  %s653_s8 = smov (%p213_p10), 0.0   ;;  %v281_v41 = vld [vmem:[%s881_s1] sm:$0x1] (%p213_p10) }
  0x5f   : > { %v282_v45 = vld [vmem:[%s882_s2] sm:$0x1] (%p213_p10) }
  0x62   : > { %v249_v21 = vld [vmem:[#allocation2] sm:$0x1] (%p213_p10) }
  0x63   : > { %v251_v23 = vsel (%p213_p10), %vm250_vm1, %v249_v21, 0.0 }
  0x64   : > { %v261_v22 = vld [vmem:[#allocation3] sm:$0x1] (%p213_p10)  ;;  %252 = vadd.xlane.f32.xlu0 (%p213_p10), %v251_v23 }
  0x65   : > { %v262_v24 = vsel %vm250_vm1, %v261_v22, 0.0 }
  0x68   : > { %263 = vadd.xlane.f32.xlu0 %v262_v24 }
  0xf1   : > { %v253_v25 = vpop.xlane.xlu0 %252 }
  0xf2   : > { %v254_v26 = vrot.slane %v253_v25, 4 }
  0xf4   : > { %v255_v27 = vadd.f32 %v254_v26, %v253_v25 }
  0xf5   : > { %v264_v28 = vpop.xlane.xlu0 %263 }
  0xf6   : > { %v256_v29 = vrot.slane %v255_v27, 2  ;;  %v265_v30 = vrot.slane %v264_v28, 4 }
  0xf8   : > { %v266_v31 = vadd.f32 %v265_v30, %v264_v28  ;;  %v257_v32 = vadd.f32 %v256_v29, %v255_v27 }
  0xfa   : > { %v267_v33 = vrot.slane %v266_v31, 2  ;;  %v258_v34 = vrot.slane %v257_v32, 1 }
  0xfc   : > { %v268_v35 = vadd.f32 %v267_v33, %v266_v31  ;;  %v259_v36 = vadd.f32 %v258_v34, %v257_v32 }
  0xfe   : > { %433 = vpush %v259_v36  ;;  %v269_v37 = vrot.slane %v268_v35, 1 }
 0x100   : > { %v270_v38 = vadd.f32 %v269_v37, %v268_v35 }
 0x102   : > { %435 = vpush %v270_v38 }
 0x12f   : > { %s434_s26 = spop %433 }
 0x130   : > { %s272_s11 = smul.f32 0.00390625, %s434_s26 }
 0x132   : > { %s274_s20 = smul.f32 %s272_s11, %s272_s11  ;;  %v286_v44 = vstv %s272_s11 }
 0x133   : > { %s436_s21 = spop %435 }
 0x134   : > { %s273_s7 = smul.f32 0.00390625, %s436_s21 }
 0x136   : > { %s275_s30 = ssub.f32 %s273_s7, %s274_s20 }
 0x138   : > { %s276_s10 = smax.f32 %s653_s8, %s275_s30 }
 0x139   : > { %s277_s28 = sadd.f32 1e-05, %s276_s10 }
 0x13b   : > { %v278_v39 = vstv %s277_s28 }
 0x13c   : > { %519 = vrsqrt.f32 %v278_v39 }
 0x146   : > { %v520_v40 = vpop.eup %519 }
 0x147   : > { %437 = vpush %v520_v40 }
 0x178   : > { %s438_s0 = spop %437 }
 0x179   : > { %v283_v42 = vstv %s438_s0 }
 0x17a   : > { %v284_v43 = vmul.f32 %v283_v42, %v281_v41 }
 0x17c   : > { %285 = vst [vmem:[#allocation4] sm:$0x1] %v284_v43  ;;  %v287_v46 = vmul.f32 %v286_v44, %v284_v43 }
 0x17e   : > { %v288_v47 = vsub.f32 %v282_v45, %v287_v46 }
 0x180   : > { %289 = vst [vmem:[#allocation5] sm:$0x1] %v288_v47 }
 0x181 PF: > { %p425_p9 = scmp.ne.s32.totalorder %s633_s15, 1 }
 0x182   : > { %v294_v48 = vld [vmem:[%s803_s6] sm:$0x3] (!%p425_p9) }
 0x183   : > { %293 = sbr.rel (%p425_p9) target bundleno = 395 (0x18b), region = 52  ;;  %v426_v49 = vld [vmem:[#allocation4] ss:$0 sm:$0xff] (!%p425_p9) }
 0x184   : > { %v302_v51 = vmul.f32 (!%p425_p9), %v426_v49, %v294_v48 }
 0x187   : > { %v427_v50 = vld [vmem:[#allocation5] ss:$0 sm:$0xff] (!%p425_p9) }
 0x188   : > { %v310_v52 = vadd.f32 (!%p425_p9), %v427_v50, %v302_v51 }
 0x18a   : > { %311 = vst [vmem:[%s810_s9] sm:$0x3] %v310_v52 }
 0x18b PF: > { %s429_s0 = sshll.u32 %s637_s16, 5  ;;  %s328_s15 = sshll.u32 %s810_s9, 4  ;;  %s329_s15 = int_to_ptr.vmem [resolvable:$true] %s328_s15 }
 0x18c   : > { %s831_s20 = scalar_lea.hbm %s883_s3, %s429_s0  ;;  %s313_s21 = scalar_lea.sflag [#allocation8], %s799_s24 }
 0x18d   : > { %s551_s6 = scalar_lea.vmem %s329_s15, 32  ;;  %p896_p7 = scmp.ne.s32.totalorder %s890_s27, 0 }
 0x18e   : > { %p552_p0 = scmp.ne.s32.totalorder %s329_s15, %s551_s6  ;;  %s654_s7 = smov [#allocation9]  }
 0x18f   : > { %s555_s30 = sshll.u32 %s654_s7, 4  ;;  %s556_s30 = int_to_ptr.vmem [resolvable:$false] %s555_s30 }
 0x190   : > { %p553_p13 = pnand %p552_p0, %p896_p7  ;;  %s557_s8 = scalar_lea.vmem %s556_s30, 64 }
 0x191   : > { %p558_p6 = scmp.lt.s32.totalorder %s329_s15, %s556_s30  ;;  %p559_p3 = scmp.lt.s32.totalorder %s557_s8, %s551_s6 }
 0x192   : > { %p554_p4 = pneg %p553_p13 }
 0x193   : > { %p560_p8 = por %p559_p3, %p558_p6 }
 0x195   : > { %p561_p12 = pnand %p560_p8, %p554_p4 }
 0x197   : > { %564 = shalt.err (!%p561_p12)
}
 0x198   : > { %s565_s16 = scalar_lea.hbm %s831_s20, 32  ;;  %s569_s10 = scalar_lea.hbm %s883_s3, 64 }
 0x199   : > { %p566_p1 = scmp.ne.s32.totalorder %s831_s20, %s565_s16  ;;  %p570_p10 = scmp.lt.u32.totalorder %s831_s20, %s883_s3 }
 0x19a   : > { %p571_p11 = scmp.lt.u32.totalorder %s569_s10, %s565_s16  ;;  %p573_p0 = scmp.lt.u32.totalorder %s565_s16, %s831_s20 }
 0x19b   : > { %p567_p2 = pnand %p566_p1, %p896_p7 }
 0x19c   : > { %p572_p9 = por %p571_p11, %p570_p10 }
 0x19d   : > { %p568_p5 = pneg %p567_p2 }
 0x19e   : > { %p574_p13 = por %p573_p0, %p572_p9 }
 0x1a0   : > { %p575_p4 = pnand %p574_p13, %p568_p5 }
 0x1a2   : > { %578 = shalt.err (!%p575_p4)
}
 0x1a3   : > { %441 = dma.vmem_to_hbm [thread:$0]  (%p896_p7), %s329_s15, 32, %s831_s20, %s313_s21  }
 0x1a4 PF: > { %p452_p6 = scmp.ge.s32.totalorder %s649_s19, 2  ;;  %s340_s25 = sand.u32 1, %s621_s12  }
 0x1a5   : > { %p897_p3 = scmp.ne.s32.totalorder %s891_s29, 0  ;;  %s341_s26 = scalar_lea.sflag [#allocation8], %s340_s25 }
 0x1a7   : > { %p448_p8 = pnand %p452_p6, %p897_p3 }
 0x1a9   : > { %616 = dma.done.wait (!%p448_p8), %s341_s26, 32  }
 0x1aa   : > { %618 = vsyncadd (!%p448_p8), %s341_s26, 4294967264  ;;  %s19_s19 = sadd.s32 1, %s649_s19   ;;  %s898_s27 = sld [smem:[#allocation12_spill]] }
 0x1ab   : > { %p16_p12 = scmp.ge.s32.totalorder %s19_s19, 6   ;;  %s899_s12 = smov %s625_s13 }
 0x1ac   : > { %s900_s13 = smov %s629_s14  ;;  %s901_s14 = smov %s751_s4 }
 0x1ad   : > { %s902_s15 = smov %s641_s17  ;;  %s903_s16 = smov %s645_s18 }
 0x1ae   : > { %s904_s17 = smov %s907_s22  ;;  %18 = sbr.rel (!%p16_p12) target bundleno = 9 (0x9), region = 93 }
 0x1b0   : > { %s905_s18 = smov %s898_s27 }
 0x1b5   :  { %346 = vsyncpa [#allocation7], 1 }
 0x1b6   :  { %348 = vsyncpa [#allocation7 + $0x1], 1 }
 0x1b7   :  { %349 = vsyncpa [#allocation8], 1 }
 0x1b8   :  { %351 = vsyncpa [#allocation8 + $0x1], 1 }

</bundles_post_ra>
